<compile_context>
chip_gen: v7x
topology: tpu7x:2x2x1
jax: 0.10.0
libtpu: 0.0.40
codegen_flags: <defaults>
</compile_context>

<pallas_src>
import math

import numpy as np
import jax
import jax.numpy as jnp
from jax.experimental import pallas as pl
from jax.experimental.pallas import tpu as pltpu


def _pos2d_kernel(ty_ref, tx_ref, o_ref):
    """out[c, h, w] = T_y[c, h] + T_x[c, w]; exactly one term is nonzero per channel.

    ty_ref: (tE, tH, 1) f32   tx_ref: (tE, 1, W) f32   o_ref: (tE, tH, W) out_dtype
    """
    o_ref[...] = (ty_ref[...] + tx_ref[...]).astype(o_ref.dtype)


def _round_up(v, m):
    return -(-v // m) * m


def _set_bytes(tE, tH, W, out_elem):
    """Approximate VMEM bytes for one (not-yet-double-buffered) set of blocks."""
    out_b = tE * _round_up(tH, 8) * _round_up(W, 128) * out_elem
    ty_b = tE * _round_up(tH, 8) * 128 * 4            # (tE, tH, 1) f32, lane-padded
    tx_b = tE * 8 * _round_up(W, 128) * 4             # (tE, 1, W)  f32, sublane-padded
    return out_b + ty_b + tx_b


def _pick_tiles(E, H, W, out_elem, target_bytes=6 << 20):
    """Choose (tE, tH) obeying the (8,128)/full-dim rules, sized to ~target_bytes."""
    e_cands = [t for t in range(1, E + 1) if E % t == 0 and (t % 8 == 0 or t == E)]
    h_cands = [t for t in range(1, H + 1) if H % t == 0 and (t % 8 == 0 or t == H)]
    te_min = min(e_cands)
    # Keep full-H blocks unless even the smallest channel tile overflows the budget.
    tH = H
    if _set_bytes(te_min, H, W, out_elem) > target_bytes:
        tH = min(h_cands)
        for cand in sorted(h_cands, reverse=True):
            if _set_bytes(te_min, cand, W, out_elem) <= target_bytes:
                tH = cand
                break
    fitting = [t for t in e_cands if _set_bytes(t, tH, W, out_elem) <= target_bytes]
    if not fitting:
        # TODO(synk): for E with no multiple-of-8 divisor AND a huge H*W this single block
        # may still exceed scoped VMEM; vmem_limit_bytes below is raised to cover realistic sizes.
        fitting = [te_min]
    # Prefer >= 2 channel tiles so the "parallel" grid can shard across v7x's two
    # TensorCores (harmless on single-core v5e/v6e).
    preferred = [t for t in fitting if t <= E // 2] or fitting
    return max(preferred), tH


def position_embedding_2d_slab(E, H, W, temperature=10000, normalize=False, scale=None,
                               out_dtype=jnp.float32):
    """Batch-independent (E, H, W) slab of the 2D sine positional encoding."""
    if scale is not None and normalize is False:
        raise ValueError("normalize should be True if scale is passed")
    if scale is None:
        scale = 2 * math.pi
    assert E % 2 == 0, "Embedding size should be even number"
    assert (E // 2) % 2 == 0, "E//2 must be even (same constraint as torch.stack in reference)"

    half = E // 2

    # ---- trace-time (numpy, float64) sin/cos tables --------------------------------
    j = np.arange(half)
    inv_dim_t = 1.0 / (float(temperature) ** (2.0 * (j // 2) / float(half)))
    yy = np.arange(1, H + 1, dtype=np.float64)          # cumsum of ones along H
    xx = np.arange(1, W + 1, dtype=np.float64)          # cumsum of ones along W
    if normalize:
        eps = 1e-6
        yy = yy / (float(H) + eps) * scale               # last cumsum value along H is H
        xx = xx / (float(W) + eps) * scale
    arg_y = inv_dim_t[:, None] * yy[None, :]             # (E/2, H)
    arg_x = inv_dim_t[:, None] * xx[None, :]             # (E/2, W)
    is_sin = (j % 2 == 0)[:, None]                        # even channel-in-half -> sin, odd -> cos
    ty = np.zeros((E, H, 1), np.float32)
    tx = np.zeros((E, 1, W), np.float32)
    ty[:half, :, 0] = np.where(is_sin, np.sin(arg_y), np.cos(arg_y))
    tx[half:, 0, :] = np.where(is_sin, np.sin(arg_x), np.cos(arg_x))

    out_elem = np.dtype(out_dtype).itemsize
    tE, tH = _pick_tiles(E, H, W, out_elem)
    n_e, n_h = E // tE, H // tH
    vmem_bytes = int(min(48 << 20,
                         max(16 << 20, 2 * _set_bytes(tE, tH, W, out_elem) + (2 << 20))))

    pos = pl.pallas_call(
        _pos2d_kernel,
        out_shape=jax.ShapeDtypeStruct((E, H, W), out_dtype),
        grid=(n_e, n_h),
        in_specs=[
            pl.BlockSpec((tE, tH, 1), lambda e, h: (e, h, 0)),   # T_y
            pl.BlockSpec((tE, 1, W), lambda e, h: (e, 0, 0)),    # T_x
        ],
        out_specs=pl.BlockSpec((tE, tH, W), lambda e, h: (e, h, 0)),
        compiler_params=pltpu.CompilerParams(
            dimension_semantics=("parallel", "parallel"),
            vmem_limit_bytes=vmem_bytes),
    )(jnp.asarray(ty), jnp.asarray(tx))
    return pos


def position_embedding_2d(N, E, H, W, temperature=10000, normalize=False, scale=None,
                          out_dtype=jnp.float32):
    """Pallas equivalent of PositionEmbeddding2D().forward(N, E, H, W) -> (N, E, H, W).

    The encoding is batch-independent; the broadcast below is free only when the result is
    consumed (e.g. added to a feature map) inside the same jit so XLA fuses it.  Otherwise
    prefer position_embedding_2d_slab() and broadcast at the use site.
    """
    pos = position_embedding_2d_slab(E, H, W, temperature, normalize, scale, out_dtype)
    return jnp.broadcast_to(pos[None], (N, E, H, W))


def _reference(N, E, H, W, temperature=10000.0, normalize=False, scale=None):
    """Plain-JAX transcription of the PyTorch forward."""
    if scale is None:
        scale = 2 * math.pi
    y = jnp.cumsum(jnp.ones((N, H, W), jnp.float32), axis=1)
    x = jnp.cumsum(jnp.ones((N, H, W), jnp.float32), axis=2)
    if normalize:
        eps = 1e-6
        y = y / (y[:, -1:, :] + eps) * scale
        x = x / (x[:, :, -1:] + eps) * scale
    dim_t = jnp.arange(E // 2, dtype=jnp.float32)
    dim_t = temperature ** (2.0 * jnp.floor(dim_t / 2.0) / (E // 2))
    pos_x = x[:, :, :, None] / dim_t
    pos_y = y[:, :, :, None] / dim_t
    pos_x = jnp.stack(
        (jnp.sin(pos_x[..., 0::2]), jnp.cos(pos_x[..., 1::2])), axis=4
    ).reshape(N, H, W, -1)
    pos_y = jnp.stack(
        (jnp.sin(pos_y[..., 0::2]), jnp.cos(pos_y[..., 1::2])), axis=4
    ).reshape(N, H, W, -1)
    pos = jnp.concatenate((pos_y, pos_x), axis=3)
    return jnp.transpose(pos, (0, 3, 1, 2))


if __name__ == "__main__":
    # The module's forward only consumes scalar sizes; derive them from a small
    # deterministic dummy feature map (NCHW) the encoding would be added to.
    key = jax.random.PRNGKey(0)
    feat = jax.random.normal(key, (2, 32, 16, 16), jnp.float32)   # (N, E, H, W)
    N, E, H, W = feat.shape

    # normalize=False path (f32, bit-for-bit semantics of the module).
    pos = jax.block_until_ready(position_embedding_2d(N, E, H, W))
    ref = jax.block_until_ready(_reference(N, E, H, W))
    assert pos.shape == (N, E, H, W) and pos.dtype == jnp.float32
    assert jnp.allclose(pos, ref, atol=1e-4, rtol=1e-4), float(jnp.max(jnp.abs(pos - ref)))

    # normalize=True path (scale defaults to 2*pi).
    pos_n = jax.block_until_ready(position_embedding_2d(N, E, H, W, normalize=True))
    ref_n = jax.block_until_ready(_reference(N, E, H, W, normalize=True))
    assert jnp.allclose(pos_n, ref_n, atol=1e-4, rtol=1e-4), float(jnp.max(jnp.abs(pos_n - ref_n)))

    # bf16 output path: store-bound HBM traffic halved; arithmetic stays f32 in-kernel.
    pos_bf16 = jax.block_until_ready(position_embedding_2d_slab(E, H, W, out_dtype=jnp.bfloat16))
    assert pos_bf16.shape == (E, H, W) and pos_bf16.dtype == jnp.bfloat16
    assert jnp.allclose(pos_bf16.astype(jnp.float32), ref[0], atol=1e-2, rtol=1e-2)

    print("KERNEL_OK")
</pallas_src>

<mosaic_0001>
module attributes {stable_mosaic.version = 11 : i64} {
  func.func @_pos2d_kernel(%arg0: i32, %arg1: i32, %arg2: memref<16x16x1xf32, #tpu.memory_space<vmem>>, %arg3: memref<16x1x16xf32, #tpu.memory_space<vmem>>, %arg4: memref<16x16x16xf32, #tpu.memory_space<vmem>>) attributes {dimension_semantics = [#tpu.dimension_semantics<parallel>, #tpu.dimension_semantics<parallel>], iteration_bounds = array<i64: 2, 1>, scalar_prefetch = 0 : i64, scratch_operands = 0 : i64, tpu.core_type = #tpu.core_type<tc>, window_params = [{transform_indices = @transform_0, window_bounds = array<i64: 16, 16, 1>}, {transform_indices = @transform_1, window_bounds = array<i64: 16, 1, 16>}, {transform_indices = @transform_2, window_bounds = array<i64: 16, 16, 16>}]} {
    %c0 = arith.constant 0 : index
    %c0_0 = arith.constant 0 : index
    %c0_1 = arith.constant 0 : index
    %0 = vector.load %arg2[%c0, %c0_0, %c0_1] : memref<16x16x1xf32, #tpu.memory_space<vmem>>, vector<16x16x1xf32>
    %c0_2 = arith.constant 0 : index
    %c0_3 = arith.constant 0 : index
    %c0_4 = arith.constant 0 : index
    %1 = vector.load %arg3[%c0_2, %c0_3, %c0_4] : memref<16x1x16xf32, #tpu.memory_space<vmem>>, vector<16x1x16xf32>
    %2 = vector.broadcast %0 : vector<16x16x1xf32> to vector<16x16x16xf32>
    %3 = vector.broadcast %1 : vector<16x1x16xf32> to vector<16x16x16xf32>
    %4 = arith.addf %2, %3 : vector<16x16x16xf32>
    %c0_5 = arith.constant 0 : index
    %c0_6 = arith.constant 0 : index
    %c0_7 = arith.constant 0 : index
    %5 = vector.load %arg4[%c0_5, %c0_6, %c0_7] : memref<16x16x16xf32, #tpu.memory_space<vmem>>, vector<16x16x16xf32>
    tpu.vector_store %arg4[%c0_5, %c0_6, %c0_7], %4 {strides = array<i32>} : memref<16x16x16xf32, #tpu.memory_space<vmem>>, vector<16x16x16xf32>,
    return
  }
  func.func @transform_0(%arg0: i32, %arg1: i32) -> (i32, i32, i32) {
    %c0_i32 = arith.constant 0 : i32
    %c0_i32_0 = arith.constant 0 : i32
    return %arg0, %arg1, %c0_i32 : i32, i32, i32
  }
  func.func @transform_1(%arg0: i32, %arg1: i32) -> (i32, i32, i32) {
    %c0_i32 = arith.constant 0 : i32
    %c0_i32_0 = arith.constant 0 : i32
    %c0_i32_1 = arith.constant 0 : i32
    return %arg0, %c0_i32, %c0_i32_0 : i32, i32, i32
  }
  func.func @transform_2(%arg0: i32, %arg1: i32) -> (i32, i32, i32) {
    %c0_i32 = arith.constant 0 : i32
    %c0_i32_0 = arith.constant 0 : i32
    return %arg0, %arg1, %c0_i32 : i32, i32, i32
  }
}

</mosaic_0001>

<bundles_post_ra>
// kernel: tpu_custom_call.1
= control target key start
LH: loop header
LB: loop body
LE: loop exit
PB: predicated region body
PF: predicated region fallthrough
CT: control target
= control target key end

     0   :  { %s777_s9 = smov 0   ;;  %s779_s10 = smov 0   ;;  %s939_s0 = inlined_call_operand.vmem [shape: f32[32,16,1], index: 0, kind: input, shape index: {}]   ;;  %s940_s1 = inlined_call_operand.vmem [shape: f32[32,1,16], index: 1, kind: input, shape index: {}]   ;;  %s941_s2 = inlined_call_operand.vmem [shape: f32[32,16,16], index: 2, kind: output, shape index: {}]  }
   0x1   :  { %s781_s11 = smov 0  }
   0x2 LB: > { %s24_s12 = sadd.s32 1, %s755_s10  ;;  %p682_p0 = scmp.ge.s32.totalorder %s759_s11, 1  ;;  %s759_s11 = sphi %s781_s11, %s12_s11   ;;  %s755_s10 = sphi %s779_s10, %s943_s10   ;;  %s751_s9 = sphi %s777_s9, %s942_s9  }
   0x3   : > { %p26_p1 = scmp.ge.s32.totalorder %s24_s12, 2  ;;  %p145_p2 = scmp.lt.s32.totalorder %s759_s11, 3 }
   0x5   : > { %s945_s12 = smov (%p26_p1, %s24_s12), 0  ;;  %p146_p3 = pnand %p682_p0, %p145_p2 }
   0x6   : > { %s683_s13 = sshll.u32 (!%p146_p3), %s751_s9, 4  ;;  %v761_v0 = vmov (!%p146_p3), 0   ;;  %vm546_vm0 = vcmask (!%p146_p3), 130048  }
   0x7   : > { %149 = sbr.rel (%p146_p3) target bundleno = 209 (0xd1), region = 28  ;;  %736 = vset.pattern.permute.xlu1 (!%p146_p3), %v761_v0  ;;  %735 = vset.pattern.permute.xlu0 (!%p146_p3), %v761_v0  ;;  %p183_p4 = scmp.lt.s32.totalorder (!%p146_p3), %s683_s13, 31 }
   0xe   : > { %s947_s13 = smov (!%p183_p4, %s683_s13), 31 }
   0xf   : > { %s708_s14 = sshll.u32 %s947_s13, 4  ;;  %s841_s20 = scalar_lea.vmem %s940_s1, %s947_s13 }
  0x10   : > { %s803_s17 = scalar_lea.vmem %s939_s0, %s708_s14  ;;  %v691_v33 = vld [vmem:[%s841_s20 + $0x1] ss:$0 sm:$0xff]  ;;  %v690_v34 = vld [vmem:[%s841_s20] ss:$0 sm:$0xff]  ;;  %s850_s23 = scalar_lea.vmem %s941_s2, %s708_s14  ;;  %v692_v43 = vld [vmem:[%s841_s20 + $0x2] ss:$0 sm:$0xff] }
  0x11   : > { %v212_v1 = vld [vmem:[%s803_s17 + $0x10] sm:$0xff]  ;;  %v210_v2 = vld [vmem:[%s803_s17] sm:$0xff]  ;;  %v213_v3 = vld [vmem:[%s803_s17 + $0x18] sm:$0xff] }
  0x12   : > { %270 = vperm.xlu1 %736, %v212_v1   ;;  %260 = vperm.xlu0 %735, %v210_v2   ;;  %v211_v4 = vld [vmem:[%s803_s17 + $0x8] sm:$0xff]  ;;  %v214_v6 = vld [vmem:[%s803_s17 + $0x20] sm:$0xff]  ;;  %v217_v7 = vld [vmem:[%s803_s17 + $0x38] sm:$0xff] }
  0x13   : > { %v215_v5 = vld [vmem:[%s803_s17 + $0x28] sm:$0xff]  ;;  %v216_v8 = vld [vmem:[%s803_s17 + $0x30] sm:$0xff]  ;;  %v218_v10 = vld [vmem:[%s803_s17 + $0x40] sm:$0xff] }
  0x14   : > { %v219_v9 = vld [vmem:[%s803_s17 + $0x48] sm:$0xff]  ;;  %v221_v11 = vld [vmem:[%s803_s17 + $0x58] sm:$0xff]  ;;  %v220_v12 = vld [vmem:[%s803_s17 + $0x50] sm:$0xff] }
  0x15   : > { %v223_v13 = vld [vmem:[%s803_s17 + $0x68] sm:$0xff]  ;;  %v222_v14 = vld [vmem:[%s803_s17 + $0x60] sm:$0xff]  ;;  %v225_v15 = vld [vmem:[%s803_s17 + $0x78] sm:$0xff] }
  0x16   : > { %275 = vperm.xlu1 %736, %v213_v3   ;;  %265 = vperm.xlu0 %735, %v211_v4   ;;  %v224_v16 = vld [vmem:[%s803_s17 + $0x70] sm:$0xff]  ;;  %v227_v17 = vld [vmem:[%s803_s17 + $0x88] sm:$0xff]  ;;  %v226_v18 = vld [vmem:[%s803_s17 + $0x80] sm:$0xff] }
  0x17   : > { %v229_v19 = vld [vmem:[%s803_s17 + $0x98] sm:$0xff]  ;;  %v228_v20 = vld [vmem:[%s803_s17 + $0x90] sm:$0xff]  ;;  %v231_v21 = vld [vmem:[%s803_s17 + $0xa8] sm:$0xff] }
  0x18   : > { %v230_v22 = vld [vmem:[%s803_s17 + $0xa0] sm:$0xff]  ;;  %v233_v23 = vld [vmem:[%s803_s17 + $0xb8] sm:$0xff]  ;;  %v232_v24 = vld [vmem:[%s803_s17 + $0xb0] sm:$0xff] }
  0x19   : > { %v235_v25 = vld [vmem:[%s803_s17 + $0xc8] sm:$0xff]  ;;  %v234_v26 = vld [vmem:[%s803_s17 + $0xc0] sm:$0xff]  ;;  %v237_v27 = vld [vmem:[%s803_s17 + $0xd8] sm:$0xff] }
  0x1a   : > { %285 = vperm.xlu1 %736, %v215_v5   ;;  %280 = vperm.xlu0 %735, %v214_v6   ;;  %v236_v28 = vld [vmem:[%s803_s17 + $0xd0] sm:$0xff]  ;;  %v239_v29 = vld [vmem:[%s803_s17 + $0xe8] sm:$0xff]  ;;  %v238_v30 = vld [vmem:[%s803_s17 + $0xe0] sm:$0xff] }
  0x1b   : > { %v241_v31 = vld [vmem:[%s803_s17 + $0xf8] sm:$0xff]  ;;  %v240_v32 = vld [vmem:[%s803_s17 + $0xf0] sm:$0xff]  ;;  %v693_v48 = vld [vmem:[%s841_s20 + $0x3] ss:$0 sm:$0xff] }
  0x1c   : > { %v694_v53 = vld [vmem:[%s841_s20 + $0x4] ss:$0 sm:$0xff]  ;;  %v695_v58 = vld [vmem:[%s841_s20 + $0x5] ss:$0 sm:$0xff]  ;;  %v696_v63 = vld [vmem:[%s841_s20 + $0x6] ss:$0 sm:$0xff] }
  0x1d   : > { %v697_v4 = vld [vmem:[%s841_s20 + $0x7] ss:$0 sm:$0xff] }
  0x1e   : > { %295 = vperm.xlu1 %736, %v217_v7   ;;  %290 = vperm.xlu0 %735, %v216_v8  }
  0x22   : > { %305 = vperm.xlu1 %736, %v219_v9   ;;  %300 = vperm.xlu0 %735, %v218_v10   ;;  %v698_v9 = vld [vmem:[%s841_s20 + $0x8] ss:$0 sm:$0xff] }
  0x26   : > { %315 = vperm.xlu1 %736, %v221_v11   ;;  %310 = vperm.xlu0 %735, %v220_v12  }
  0x2a   : > { %325 = vperm.xlu1 %736, %v223_v13   ;;  %320 = vperm.xlu0 %735, %v222_v14   ;;  %v699_v14 = vld [vmem:[%s841_s20 + $0x9] ss:$0 sm:$0xff] }
  0x2e   : > { %335 = vperm.xlu1 %736, %v225_v15   ;;  %330 = vperm.xlu0 %735, %v224_v16  }
  0x32   : > { %345 = vperm.xlu1 %736, %v227_v17   ;;  %340 = vperm.xlu0 %735, %v226_v18  }
  0x36   : > { %355 = vperm.xlu1 %736, %v229_v19   ;;  %350 = vperm.xlu0 %735, %v228_v20   ;;  %v700_v19 = vld [vmem:[%s841_s20 + $0xa] ss:$0 sm:$0xff] }
  0x3a   : > { %365 = vperm.xlu1 %736, %v231_v21   ;;  %360 = vperm.xlu0 %735, %v230_v22  }
  0x3e   : > { %375 = vperm.xlu1 %736, %v233_v23   ;;  %370 = vperm.xlu0 %735, %v232_v24   ;;  %v701_v24 = vld [vmem:[%s841_s20 + $0xb] ss:$0 sm:$0xff] }
  0x42   : > { %385 = vperm.xlu1 %736, %v235_v25   ;;  %380 = vperm.xlu0 %735, %v234_v26  }
  0x46   : > { %395 = vperm.xlu1 %736, %v237_v27   ;;  %390 = vperm.xlu0 %735, %v236_v28  }
  0x4a   : > { %405 = vperm.xlu1 %736, %v239_v29   ;;  %400 = vperm.xlu0 %735, %v238_v30   ;;  %v702_v29 = vld [vmem:[%s841_s20 + $0xc] ss:$0 sm:$0xff] }
  0x4e   : > { %415 = vperm.xlu1 %736, %v241_v31   ;;  %410 = vperm.xlu0 %735, %v240_v32  }
  0x91   : > { %v271_v35 = vpop.permute.xlu1 %270  ;;  %v261_v36 = vpop.permute.xlu0 %260 }
  0x92   : > { %v516_v37 = vadd.f32 %v691_v33, %v271_v35  ;;  %v514_v38 = vadd.f32 %v690_v34, %v261_v36 }
  0x94   : > { %549 = vst.msk [vmem:[%s850_s23 + $0x10] sm:$0xff] %vm546_vm0, %v516_v37  ;;  %547 = vst.msk [vmem:[%s850_s23] sm:$0xff] %vm546_vm0, %v514_v38 }
  0x95   : > { %v276_v39 = vpop.permute.xlu1 %275  ;;  %v266_v40 = vpop.permute.xlu0 %265 }
  0x96   : > { %v517_v41 = vadd.f32 %v691_v33, %v276_v39  ;;  %v515_v42 = vadd.f32 %v690_v34, %v266_v40  ;;  %v703_v34 = vld [vmem:[%s841_s20 + $0xd] ss:$0 sm:$0xff]  ;;  %v704_v39 = vld [vmem:[%s841_s20 + $0xe] ss:$0 sm:$0xff] }
  0x98   : > { %550 = vst.msk [vmem:[%s850_s23 + $0x18] sm:$0xff] %vm546_vm0, %v517_v41  ;;  %548 = vst.msk [vmem:[%s850_s23 + $0x8] sm:$0xff] %vm546_vm0, %v515_v42 }
  0x99   : > { %v286_v44 = vpop.permute.xlu1 %285  ;;  %v281_v45 = vpop.permute.xlu0 %280 }
  0x9a   : > { %v519_v46 = vadd.f32 %v692_v43, %v286_v44  ;;  %v518_v47 = vadd.f32 %v692_v43, %v281_v45  ;;  %v705_v44 = vld [vmem:[%s841_s20 + $0xf] ss:$0 sm:$0xff] }
  0x9c   : > { %552 = vst.msk [vmem:[%s850_s23 + $0x28] sm:$0xff] %vm546_vm0, %v519_v46  ;;  %551 = vst.msk [vmem:[%s850_s23 + $0x20] sm:$0xff] %vm546_vm0, %v518_v47 }
  0x9d   : > { %v296_v49 = vpop.permute.xlu1 %295  ;;  %v291_v50 = vpop.permute.xlu0 %290 }
  0x9e   : > { %v521_v51 = vadd.f32 %v693_v48, %v296_v49  ;;  %v520_v52 = vadd.f32 %v693_v48, %v291_v50 }
  0xa0   : > { %554 = vst.msk [vmem:[%s850_s23 + $0x38] sm:$0xff] %vm546_vm0, %v521_v51  ;;  %553 = vst.msk [vmem:[%s850_s23 + $0x30] sm:$0xff] %vm546_vm0, %v520_v52 }
  0xa1   : > { %v306_v54 = vpop.permute.xlu1 %305  ;;  %v301_v55 = vpop.permute.xlu0 %300 }
  0xa2   : > { %v523_v56 = vadd.f32 %v694_v53, %v306_v54  ;;  %v522_v57 = vadd.f32 %v694_v53, %v301_v55 }
  0xa4   : > { %556 = vst.msk [vmem:[%s850_s23 + $0x48] sm:$0xff] %vm546_vm0, %v523_v56  ;;  %555 = vst.msk [vmem:[%s850_s23 + $0x40] sm:$0xff] %vm546_vm0, %v522_v57 }
  0xa5   : > { %v316_v59 = vpop.permute.xlu1 %315  ;;  %v311_v60 = vpop.permute.xlu0 %310 }
  0xa6   : > { %v525_v61 = vadd.f32 %v695_v58, %v316_v59  ;;  %v524_v62 = vadd.f32 %v695_v58, %v311_v60 }
  0xa8   : > { %558 = vst.msk [vmem:[%s850_s23 + $0x58] sm:$0xff] %vm546_vm0, %v525_v61  ;;  %557 = vst.msk [vmem:[%s850_s23 + $0x50] sm:$0xff] %vm546_vm0, %v524_v62 }
  0xa9   : > { %v326_v0 = vpop.permute.xlu1 %325  ;;  %v321_v1 = vpop.permute.xlu0 %320 }
  0xaa   : > { %v527_v2 = vadd.f32 %v696_v63, %v326_v0  ;;  %v526_v3 = vadd.f32 %v696_v63, %v321_v1 }
  0xac   : > { %560 = vst.msk [vmem:[%s850_s23 + $0x68] sm:$0xff] %vm546_vm0, %v527_v2  ;;  %559 = vst.msk [vmem:[%s850_s23 + $0x60] sm:$0xff] %vm546_vm0, %v526_v3 }
  0xad   : > { %v336_v5 = vpop.permute.xlu1 %335  ;;  %v331_v6 = vpop.permute.xlu0 %330 }
  0xae   : > { %v529_v7 = vadd.f32 %v697_v4, %v336_v5  ;;  %v528_v8 = vadd.f32 %v697_v4, %v331_v6 }
  0xb0   : > { %562 = vst.msk [vmem:[%s850_s23 + $0x78] sm:$0xff] %vm546_vm0, %v529_v7  ;;  %561 = vst.msk [vmem:[%s850_s23 + $0x70] sm:$0xff] %vm546_vm0, %v528_v8 }
  0xb1   : > { %v346_v10 = vpop.permute.xlu1 %345  ;;  %v341_v11 = vpop.permute.xlu0 %340 }
  0xb2   : > { %v531_v12 = vadd.f32 %v698_v9, %v346_v10  ;;  %v530_v13 = vadd.f32 %v698_v9, %v341_v11 }
  0xb4   : > { %564 = vst.msk [vmem:[%s850_s23 + $0x88] sm:$0xff] %vm546_vm0, %v531_v12  ;;  %563 = vst.msk [vmem:[%s850_s23 + $0x80] sm:$0xff] %vm546_vm0, %v530_v13 }
  0xb5   : > { %v356_v15 = vpop.permute.xlu1 %355  ;;  %v351_v16 = vpop.permute.xlu0 %350 }
  0xb6   : > { %v533_v17 = vadd.f32 %v699_v14, %v356_v15  ;;  %v532_v18 = vadd.f32 %v699_v14, %v351_v16 }
  0xb8   : > { %566 = vst.msk [vmem:[%s850_s23 + $0x98] sm:$0xff] %vm546_vm0, %v533_v17  ;;  %565 = vst.msk [vmem:[%s850_s23 + $0x90] sm:$0xff] %vm546_vm0, %v532_v18 }
  0xb9   : > { %v366_v20 = vpop.permute.xlu1 %365  ;;  %v361_v21 = vpop.permute.xlu0 %360 }
  0xba   : > { %v535_v22 = vadd.f32 %v700_v19, %v366_v20  ;;  %v534_v23 = vadd.f32 %v700_v19, %v361_v21 }
  0xbc   : > { %568 = vst.msk [vmem:[%s850_s23 + $0xa8] sm:$0xff] %vm546_vm0, %v535_v22  ;;  %567 = vst.msk [vmem:[%s850_s23 + $0xa0] sm:$0xff] %vm546_vm0, %v534_v23 }
  0xbd   : > { %v376_v25 = vpop.permute.xlu1 %375  ;;  %v371_v26 = vpop.permute.xlu0 %370 }
  0xbe   : > { %v537_v27 = vadd.f32 %v701_v24, %v376_v25  ;;  %v536_v28 = vadd.f32 %v701_v24, %v371_v26 }
  0xc0   : > { %570 = vst.msk [vmem:[%s850_s23 + $0xb8] sm:$0xff] %vm546_vm0, %v537_v27  ;;  %569 = vst.msk [vmem:[%s850_s23 + $0xb0] sm:$0xff] %vm546_vm0, %v536_v28 }
  0xc1   : > { %v386_v30 = vpop.permute.xlu1 %385  ;;  %v381_v31 = vpop.permute.xlu0 %380 }
  0xc2   : > { %v539_v32 = vadd.f32 %v702_v29, %v386_v30  ;;  %v538_v33 = vadd.f32 %v702_v29, %v381_v31 }
  0xc4   : > { %572 = vst.msk [vmem:[%s850_s23 + $0xc8] sm:$0xff] %vm546_vm0, %v539_v32  ;;  %571 = vst.msk [vmem:[%s850_s23 + $0xc0] sm:$0xff] %vm546_vm0, %v538_v33 }
  0xc5   : > { %v396_v35 = vpop.permute.xlu1 %395  ;;  %v391_v36 = vpop.permute.xlu0 %390 }
  0xc6   : > { %v541_v37 = vadd.f32 %v703_v34, %v396_v35  ;;  %v540_v38 = vadd.f32 %v703_v34, %v391_v36 }
  0xc8   : > { %574 = vst.msk [vmem:[%s850_s23 + $0xd8] sm:$0xff] %vm546_vm0, %v541_v37  ;;  %573 = vst.msk [vmem:[%s850_s23 + $0xd0] sm:$0xff] %vm546_vm0, %v540_v38 }
  0xc9   : > { %v406_v40 = vpop.permute.xlu1 %405  ;;  %v401_v41 = vpop.permute.xlu0 %400 }
  0xca   : > { %v543_v42 = vadd.f32 %v704_v39, %v406_v40  ;;  %v542_v43 = vadd.f32 %v704_v39, %v401_v41 }
  0xcc   : > { %576 = vst.msk [vmem:[%s850_s23 + $0xe8] sm:$0xff] %vm546_vm0, %v543_v42  ;;  %575 = vst.msk [vmem:[%s850_s23 + $0xe0] sm:$0xff] %vm546_vm0, %v542_v43 }
  0xcd   : > { %v416_v45 = vpop.permute.xlu1 %415  ;;  %v411_v46 = vpop.permute.xlu0 %410 }
  0xce   : > { %v545_v47 = vadd.f32 %v705_v44, %v416_v45  ;;  %v544_v48 = vadd.f32 %v705_v44, %v411_v46 }
  0xd0   : > { %578 = vst.msk [vmem:[%s850_s23 + $0xf8] sm:$0xff] %vm546_vm0, %v545_v47  ;;  %577 = vst.msk [vmem:[%s850_s23 + $0xf0] sm:$0xff] %vm546_vm0, %v544_v48 }
  0xd1 PF: > { %s12_s11 = sadd.s32 1, %s759_s11   ;;  %s942_s9 = smov %s755_s10 }
  0xd2   : > { %p9_p5 = scmp.ge.s32.totalorder %s12_s11, 4   ;;  %s943_s10 = smov %s945_s12 }
  0xd4   :  { %11 = sbr.rel (!%p9_p5) target bundleno = 2 (0x2), region = 61 }

</bundles_post_ra>
